<compile_context>
chip_gen: v5e
topology: v5e:2x2
jax: 0.10.0
libtpu: 0.0.40
codegen_flags: <defaults>
</compile_context>

<pallas_src>
import functools

import jax
import jax.numpy as jnp
from jax import lax
from jax.experimental import pallas as pl
from jax.experimental.pallas import tpu as pltpu

N_EMBED = 32
HIDDEN = 4 * N_EMBED  # 128


def _ffn_kernel(x_ref, w1_ref, b1_ref, w2_ref, b2_ref, o_ref, *,
                chunk, group, compute_dtype):
    """One row tile: out = relu(x @ W1 + b1) @ W2 + b2.

    x_ref:  (tm, Cb) activation dtype     w1_ref: (Cb, Hb) compute dtype
    b1_ref: (1, Hb)  f32                  w2_ref: (Hb, Cb) compute dtype
    b2_ref: (1, Cb)  f32                  o_ref:  (tm, Cb) out dtype
    """
    tm = x_ref.shape[0]
    hb = w1_ref.shape[1]
    cb = w2_ref.shape[1]

    w1 = w1_ref[...]
    w2 = w2_ref[...]

    def ffn_rows(r, rows, b1_b, b2_b):
        # Cast to the MXU input dtype inside the kernel (free VPU filler);
        # accumulate both matmuls in f32, bias + ReLU in f32.
        xb = x_ref[pl.ds(r, rows), :].astype(compute_dtype)
        h = jnp.dot(xb, w1, preferred_element_type=jnp.float32) + b1_b
        h = jnp.maximum(h, 0.0)
        out = jnp.dot(h.astype(compute_dtype), w2,
                      preferred_element_type=jnp.float32) + b2_b
        o_ref[pl.ds(r, rows), :] = out.astype(o_ref.dtype)

    if tm <= chunk:
        # Small tile: single pass (bias broadcasts happen exactly once).
        ffn_rows(0, tm, b1_ref[...], b2_ref[...])
        return

    # Hoist the bias broadcasts out of the chunk loop: JAX does not CSE
    # broadcast_in_dim, so re-materializing them per chunk burns VALU/layout
    # work every iteration.
    b1_b = jnp.broadcast_to(b1_ref[...], (chunk, hb))
    b2_b = jnp.broadcast_to(b2_ref[...], (chunk, cb))

    n_full = tm // chunk
    rem = tm - n_full * chunk
    n_groups = n_full // group

    if n_groups > 0:
        def body(g, carry):
            for u in range(group):            # trace-time partial unroll
                off = pl.multiple_of(g * (group * chunk) + u * chunk, chunk)
                ffn_rows(off, chunk, b1_b, b2_b)
            return carry

        lax.fori_loop(0, n_groups, body, 0, unroll=False)

    # Leftover full chunks (at most group-1; static offsets).
    for c in range(n_groups * group, n_full):
        ffn_rows(c * chunk, chunk, b1_b, b2_b)

    # Ragged tail rows inside the tile (only when tm is not a chunk multiple,
    # i.e. the single-block case).
    if rem:
        ffn_rows(n_full * chunk, rem, b1_ref[...], b2_ref[...])


def feed_forward(x, w1, b1, w2, b2, *, tm=None, chunk=None, group=4,
                 compute_dtype=jnp.bfloat16, out_dtype=None,
                 target_step_bytes=2 * 1024 * 1024):
    """x: (B, T, C). Returns (B, T, C) in `out_dtype` (default: x.dtype)."""
    B, T, C = x.shape
    H = w1.shape[1]
    M = B * T
    out_dtype = x.dtype if out_dtype is None else jnp.dtype(out_dtype)

    # ---- 4-token folding: lane-dense (width-128) I/O + K=N=128 MXU dims ----
    fold = 4 if (M % 4 == 0) else 1
    Mr = M // fold
    Cb = C * fold
    Hb = H * fold
    if fold > 1:
        eye = jnp.eye(fold, dtype=w1.dtype)
        w1f, w2f = jnp.kron(eye, w1), jnp.kron(eye, w2)   # block-diagonal
        b1f, b2f = jnp.tile(b1, fold), jnp.tile(b2, fold)
    else:
        w1f, w2f, b1f, b2f = w1, w2, b1, b2

    # No wrapper-side activation cast (that would be an extra full HBM pass of
    # x); the tile is cast to compute_dtype on the VPU inside the kernel.
    x2 = x.reshape(Mr, Cb)
    w1c = w1f.astype(compute_dtype)
    w2c = w2f.astype(compute_dtype)
    b1_2d = b1f.reshape(1, Hb).astype(jnp.float32)
    b2_2d = b2f.reshape(1, Cb).astype(jnp.float32)

    in_bytes = jnp.dtype(x.dtype).itemsize
    out_bytes = jnp.dtype(out_dtype).itemsize
    w_bytes = jnp.dtype(compute_dtype).itemsize

    # Chunk: bound the live f32 hidden (chunk, Hb) to ~64 KiB so it stays in
    # vregs instead of spilling to VMEM (spill vst competes with the output
    # store stream, worst on v5e's single store slot).
    if chunk is None:
        chunk = max(8, ((64 * 1024) // (Hb * 4)) // 8 * 8)

    # Row tile: size each grid step to move ~target_step_bytes of HBM traffic
    # (amortizes the ~0.35us fixed per-grid-step overhead); keep it a multiple
    # of `chunk` so the in-kernel loop has no ragged tail.  A single
    # full-array block is used when the whole problem fits in one step.
    sub_req = {4: 8, 2: 16, 1: 32}
    sub = max(sub_req.get(in_bytes, 8), sub_req.get(out_bytes, 8))
    if tm is None:
        bytes_per_row = Cb * (in_bytes + out_bytes)
        tm = max(sub, target_step_bytes // bytes_per_row)
    if Mr <= tm:
        tm = Mr                      # single block == full array: always legal
    else:
        q = max(chunk, sub)
        tm = max(q, (int(tm) // q) * q)
    grid = (pl.cdiv(Mr, tm),)        # ragged last block handled by Pallas

    # VMEM budget: double-buffered x/out tiles + resident weights + biases.
    vmem_need = (2 * tm * Cb * (in_bytes + out_bytes)
                 + 2 * Cb * Hb * w_bytes + (Hb + Cb) * 4)
    # Only raise the scoped limit when needed; never request more than 32 MiB
    # (v7x default scoped = 32 MiB and physical VMEM is only 64 MiB).
    vmem_limit = None
    if vmem_need > 12 * 1024 * 1024:
        vmem_limit = min(int(vmem_need * 3 // 2), 32 * 1024 * 1024)

    cost = pl.CostEstimate(
        flops=4 * Mr * Cb * Hb,            # what the MXU actually executes
        transcendentals=0,
        bytes_accessed=Mr * Cb * (in_bytes + out_bytes)
        + 2 * Cb * Hb * w_bytes + (Hb + Cb) * 4,
    )

    out = pl.pallas_call(
        functools.partial(_ffn_kernel, chunk=chunk, group=group,
                          compute_dtype=compute_dtype),
        out_shape=jax.ShapeDtypeStruct((Mr, Cb), out_dtype),
        grid_spec=pltpu.PrefetchScalarGridSpec(
            num_scalar_prefetch=0,
            grid=grid,
            in_specs=[
                pl.BlockSpec((tm, Cb), lambda i: (i, 0)),   # x row tile
                pl.BlockSpec((Cb, Hb), lambda i: (0, 0)),   # W1 (resident)
                pl.BlockSpec((1, Hb), lambda i: (0, 0)),    # b1 (f32)
                pl.BlockSpec((Hb, Cb), lambda i: (0, 0)),   # W2 (resident)
                pl.BlockSpec((1, Cb), lambda i: (0, 0)),    # b2 (f32)
            ],
            out_specs=pl.BlockSpec((tm, Cb), lambda i: (i, 0)),
        ),
        compiler_params=pltpu.CompilerParams(
            dimension_semantics=("parallel",),
            vmem_limit_bytes=vmem_limit),
        cost_estimate=cost,
    )(x2, w1c, b1_2d, w2c, b2_2d)

    return out.reshape(B, T, C)


def init_params(key, n_embed=N_EMBED):
    # Mimic nn.Linear defaults: U(-1/sqrt(fan_in), 1/sqrt(fan_in)).
    k1, k2, k3, k4 = jax.random.split(key, 4)
    h = 4 * n_embed
    bound1 = 1.0 / jnp.sqrt(n_embed)
    bound2 = 1.0 / jnp.sqrt(h)
    w1 = jax.random.uniform(k1, (n_embed, h), jnp.float32, -bound1, bound1)
    b1 = jax.random.uniform(k2, (h,), jnp.float32, -bound1, bound1)
    w2 = jax.random.uniform(k3, (h, n_embed), jnp.float32, -bound2, bound2)
    b2 = jax.random.uniform(k4, (n_embed,), jnp.float32, -bound2, bound2)
    return w1, b1, w2, b2


def feed_forward_ref(x, w1, b1, w2, b2):
    h = jnp.maximum(x @ w1 + b1, 0.0)
    return h @ w2 + b2


if __name__ == "__main__":
    key = jax.random.PRNGKey(0)
    kx, kp, kx2 = jax.random.split(key, 3)

    # --- small shapes consistent with the module ---
    B, T, C = 2, 8, N_EMBED
    x = jax.random.normal(kx, (B, T, C), dtype=jnp.float32)
    w1, b1, w2, b2 = init_params(kp)
    ref = feed_forward_ref(x, w1, b1, w2, b2)

    # Exact-precision path (f32 end to end) -> tight tolerance.
    out_f32 = jax.block_until_ready(
        feed_forward(x, w1, b1, w2, b2, compute_dtype=jnp.float32))
    assert out_f32.shape == (B, T, C), out_f32.shape
    assert jnp.allclose(out_f32, ref, atol=1e-4, rtol=1e-4), float(
        jnp.max(jnp.abs(out_f32 - ref)))

    # Fast path (default): bf16 MXU inputs, f32 accumulation.
    out_fast = jax.block_until_ready(feed_forward(x, w1, b1, w2, b2))
    assert out_fast.shape == (B, T, C), out_fast.shape
    assert out_fast.dtype == x.dtype
    assert jnp.allclose(out_fast, ref, atol=3e-2, rtol=3e-2), float(
        jnp.max(jnp.abs(out_fast - ref)))

    # --- larger shape: exercises the multi-step grid, the ragged last block,
    #     and the in-kernel chunk loop (grid = 2 at the default tile target).
    Bb, Tb = 4, 2500
    xb = jax.random.normal(kx2, (Bb, Tb, C), dtype=jnp.float32)
    refb = feed_forward_ref(xb, w1, b1, w2, b2)

    outb_f32 = jax.block_until_ready(
        feed_forward(xb, w1, b1, w2, b2, compute_dtype=jnp.float32))
    assert outb_f32.shape == (Bb, Tb, C), outb_f32.shape
    assert jnp.allclose(outb_f32, refb, atol=1e-4, rtol=1e-4), float(
        jnp.max(jnp.abs(outb_f32 - refb)))

    outb_fast = jax.block_until_ready(feed_forward(xb, w1, b1, w2, b2))
    assert outb_fast.shape == (Bb, Tb, C), outb_fast.shape
    assert jnp.allclose(outb_fast, refb, atol=5e-2, rtol=5e-2), float(
        jnp.max(jnp.abs(outb_fast - refb)))

    print("KERNEL_OK")
</pallas_src>

<mosaic_0001>
module attributes {stable_mosaic.version = 11 : i64} {
  func.func @_ffn_kernel(%arg0: i32, %arg1: memref<4x128xf32, #tpu.memory_space<vmem>>, %arg2: memref<128x512xf32, #tpu.memory_space<vmem>>, %arg3: memref<1x512xf32, #tpu.memory_space<vmem>>, %arg4: memref<512x128xf32, #tpu.memory_space<vmem>>, %arg5: memref<1x128xf32, #tpu.memory_space<vmem>>, %arg6: memref<4x128xf32, #tpu.memory_space<vmem>>) attributes {dimension_semantics = [#tpu.dimension_semantics<parallel>], iteration_bounds = array<i64: 1>, scalar_prefetch = 0 : i64, scratch_operands = 0 : i64, tpu.core_type = #tpu.core_type<tc>, window_params = [{transform_indices = @transform_0, window_bounds = array<i64: 4, 128>}, {pipeline_mode = #tpu.pipeline_mode<synchronous>, transform_indices = @transform_1, window_bounds = array<i64: 128, 512>}, {pipeline_mode = #tpu.pipeline_mode<synchronous>, transform_indices = @transform_2, window_bounds = array<i64: 1, 512>}, {pipeline_mode = #tpu.pipeline_mode<synchronous>, transform_indices = @transform_3, window_bounds = array<i64: 512, 128>}, {pipeline_mode = #tpu.pipeline_mode<synchronous>, transform_indices = @transform_4, window_bounds = array<i64: 1, 128>}, {transform_indices = @transform_5, window_bounds = array<i64: 4, 128>}]} {
    %c0 = arith.constant 0 : index
    %c0_0 = arith.constant 0 : index
    %0 = vector.load %arg2[%c0, %c0_0] : memref<128x512xf32, #tpu.memory_space<vmem>>, vector<128x512xf32>
    %c0_1 = arith.constant 0 : index
    %c0_2 = arith.constant 0 : index
    %1 = vector.load %arg4[%c0_1, %c0_2] : memref<512x128xf32, #tpu.memory_space<vmem>>, vector<512x128xf32>
    %c0_3 = arith.constant 0 : index
    %c0_4 = arith.constant 0 : index
    %2 = vector.load %arg3[%c0_3, %c0_4] : memref<1x512xf32, #tpu.memory_space<vmem>>, vector<1x512xf32>
    %c0_5 = arith.constant 0 : index
    %c0_6 = arith.constant 0 : index
    %3 = vector.load %arg5[%c0_5, %c0_6] : memref<1x128xf32, #tpu.memory_space<vmem>>, vector<1x128xf32>
    %c0_7 = arith.constant 0 : index
    %c0_8 = arith.constant 0 : index
    %4 = vector.load %arg1[%c0_7, %c0_8] : memref<4x128xf32, #tpu.memory_space<vmem>>, vector<4x128xf32>
    %cst = arith.constant dense<0.000000e+00> : vector<4x512xf32>
    %5 = tpu.matmul %4, %0, %cst {dimension_numbers = #tpu.dot_dimension_numbers<[1], [0], [0], [1], [0, 0, 1, 1], [], []>} : vector<4x128xf32>, vector<128x512xf32>, vector<4x512xf32> -> vector<4x512xf32>
    %6 = vector.broadcast %2 : vector<1x512xf32> to vector<4x512xf32>
    %7 = arith.addf %5, %6 : vector<4x512xf32>
    %cst_9 = arith.constant 0.000000e+00 : f32
    %8 = vector.broadcast %cst_9 : f32 to vector<4x512xf32>
    %9 = arith.maximumf %7, %8 : vector<4x512xf32>
    %cst_10 = arith.constant dense<0.000000e+00> : vector<4x128xf32>
    %10 = tpu.matmul %9, %1, %cst_10 {dimension_numbers = #tpu.dot_dimension_numbers<[1], [0], [0], [1], [0, 0, 1, 1], [], []>} : vector<4x512xf32>, vector<512x128xf32>, vector<4x128xf32> -> vector<4x128xf32>
    %11 = vector.broadcast %3 : vector<1x128xf32> to vector<4x128xf32>
    %12 = arith.addf %10, %11 : vector<4x128xf32>
    %c0_11 = arith.constant 0 : index
    %c0_12 = arith.constant 0 : index
    %13 = vector.load %arg6[%c0_11, %c0_12] : memref<4x128xf32, #tpu.memory_space<vmem>>, vector<4x128xf32>
    tpu.vector_store %arg6[%c0_11, %c0_12], %12 {strides = array<i32>} : memref<4x128xf32, #tpu.memory_space<vmem>>, vector<4x128xf32>,
    return
  }
  func.func @transform_0(%arg0: i32) -> (i32, i32) {
    %c0_i32 = arith.constant 0 : i32
    %c0_i32_0 = arith.constant 0 : i32
    return %arg0, %c0_i32 : i32, i32
  }
  func.func @transform_1(%arg0: i32) -> (i32, i32) {
    %c0_i32 = arith.constant 0 : i32
    %c0_i32_0 = arith.constant 0 : i32
    %c0_i32_1 = arith.constant 0 : i32
    return %c0_i32, %c0_i32_0 : i32, i32
  }
  func.func @transform_2(%arg0: i32) -> (i32, i32) {
    %c0_i32 = arith.constant 0 : i32
    %c0_i32_0 = arith.constant 0 : i32
    %c0_i32_1 = arith.constant 0 : i32
    return %c0_i32, %c0_i32_0 : i32, i32
  }
  func.func @transform_3(%arg0: i32) -> (i32, i32) {
    %c0_i32 = arith.constant 0 : i32
    %c0_i32_0 = arith.constant 0 : i32
    %c0_i32_1 = arith.constant 0 : i32
    return %c0_i32, %c0_i32_0 : i32, i32
  }
  func.func @transform_4(%arg0: i32) -> (i32, i32) {
    %c0_i32 = arith.constant 0 : i32
    %c0_i32_0 = arith.constant 0 : i32
    %c0_i32_1 = arith.constant 0 : i32
    return %c0_i32, %c0_i32_0 : i32, i32
  }
  func.func @transform_5(%arg0: i32) -> (i32, i32) {
    %c0_i32 = arith.constant 0 : i32
    %c0_i32_0 = arith.constant 0 : i32
    return %arg0, %c0_i32 : i32, i32
  }
}

</mosaic_0001>

<bundles_post_ra>
// kernel: tpu_custom_call.1
= control target key start
LH: loop header
LB: loop body
LE: loop exit
PB: predicated region body
PF: predicated region fallthrough
CT: control target
= control target key end

     0   :  { %10 = vsyncpa [#allocation3], 0  ;;  %s602_s0 = inlined_call_operand.hbm [shape: f32[4,128], index: 0, kind: input, shape index: {}]   ;;  %s603_s1 = inlined_call_operand.hbm [shape: f32[128,512], index: 1, kind: input, shape index: {}]   ;;  %s604_s2 = inlined_call_operand.hbm [shape: f32[1,512], index: 2, kind: input, shape index: {}]   ;;  %s605_s3 = inlined_call_operand.hbm [shape: f32[512,128], index: 3, kind: input, shape index: {}]   ;;  %s606_s4 = inlined_call_operand.vmem [shape: f32[1,128], index: 4, kind: input, shape index: {}]   ;;  %s607_s5 = inlined_call_operand.hbm [shape: f32[4,128], index: 5, kind: output, shape index: {}]  }
   0x1   :  { %11 = vsyncpa [#allocation6], 0 }
   0x2   :  { %12 = vsyncpa [#allocation9], 0  ;;  %s29_s20 = sshll.u32 %s603_s1, 4  ;;  %s30_s20 = int_to_ptr.hbm [resolvable:$true] %s29_s20 }
   0x3   :  { %13 = vsyncpa [#allocation4], 0  ;;  %s545_s21 = smov [#allocation5]   ;;  %s19_s25 = sshll.u32 %s602_s0, 4  ;;  %s20_s25 = int_to_ptr.hbm [resolvable:$true] %s19_s25 }
   0x4   :  { %s31_s22 = sshll.u32 %s545_s21, 4  ;;  %s546_s26 = smov 512   ;;  %s32_s22 = int_to_ptr.vmem [resolvable:$true] %s31_s22 }
   0x5   :  { %s547_s27 = smov 32   ;;  %s548_s28 = smov [#allocation2]  }
   0x6   :  { %37 = dma.hbm_to_vmem [thread:$0]  %s30_s20, 8192, %s32_s22, [#allocation6], %s546_s26, %s546_s26, %s547_s27  }
   0x7   :  { %s21_s29 = sshll.u32 %s548_s28, 4  ;;  %s43_s7 = sshll.u32 %s604_s2, 4  ;;  %s22_s29 = int_to_ptr.vmem [resolvable:$true] %s21_s29  ;;  %s44_s7 = int_to_ptr.hbm [resolvable:$true] %s43_s7 }
   0x8   :  { %24 = dma.hbm_to_vmem [thread:$0]  %s20_s25, 64, %s22_s29, [#allocation3]  }
   0x9   :  { %s53_s9 = sshll.u32 %s605_s3, 4  ;;  %s549_s10 = smov [#allocation7]   ;;  %s54_s9 = int_to_ptr.hbm [resolvable:$true] %s53_s9 }
   0xa   :  { %s45_s11 = sshll.u32 %s549_s10, 4  ;;  %s550_s0 = smov [#allocation8]   ;;  %s46_s11 = int_to_ptr.vmem [resolvable:$true] %s45_s11 }
   0xb   :  { %48 = dma.hbm_to_vmem [thread:$0]  %s44_s7, 64, %s46_s11, [#allocation6]  }
   0xc   :  { %s55_s12 = sshll.u32 %s550_s0, 4  ;;  %s551_s13 = smov 128   ;;  %s56_s12 = int_to_ptr.vmem [resolvable:$true] %s55_s12 }
   0xd   :  { %s552_s14 = smov 8  }
   0xe   :  { %61 = dma.hbm_to_vmem [thread:$0]  %s54_s9, 8192, %s56_s12, [#allocation9], %s551_s13, %s551_s13, %s552_s14  }
   0xf   :  { %537 = dma.done.wait [#allocation3], 64  }
  0x10   :  { %538 = vsyncadd [#allocation3], 4294967232 }
  0x11   :  { %539 = dma.done.wait [#allocation6], 8256  }
  0x12   :  { %540 = vsyncadd [#allocation6], 4294959040 }
  0x13   :  { %541 = dma.done.wait [#allocation9], 8192  }
  0x14   :  { %542 = vsyncadd [#allocation9], 4294959104  ;;  %v142_v0 = vld [vmem:[#allocation5 + $0x1f0] sm:$0xff]  ;;  %v143_v2 = vld [vmem:[#allocation5 + $0x1f8] sm:$0xff]  ;;  %s553_s15 = smov [#allocation10]   ;;  %s395_s19 = sshll.u32 %s607_s5, 4  ;;  %s396_s19 = int_to_ptr.hbm [resolvable:$true] %s395_s19 }
  0x15   :  { %v138_v1 = vld [vmem:[#allocation5 + $0x1d0] sm:$0xff]  ;;  %260 = vmatpush.msra.mxu2 %v142_v0  ;;  %280 = vmatpush.msra.mxu3 %v143_v2  ;;  %v139_v3 = vld [vmem:[#allocation5 + $0x1d8] sm:$0xff]  ;;  %v140_v6 = vld [vmem:[#allocation5 + $0x1e0] sm:$0xff]  ;;  %s393_s16 = sshll.u32 %s553_s15, 4  ;;  %s394_s16 = int_to_ptr.vmem [resolvable:$true] %s393_s16 }
  0x16   :  { %v134_v4 = vld [vmem:[#allocation5 + $0x1b0] sm:$0xff]  ;;  %v135_v5 = vld [vmem:[#allocation5 + $0x1b8] sm:$0xff]  ;;  %v136_v7 = vld [vmem:[#allocation5 + $0x1c0] sm:$0xff]  ;;  %220 = vmatpush.msra.mxu0 %v140_v6 }
  0x17   :  { %261 = vmatpush.msra.mxu2 %v138_v1  ;;  %281 = vmatpush.msra.mxu3 %v139_v3  ;;  %v141_v8 = vld [vmem:[#allocation5 + $0x1e8] sm:$0xff]  ;;  %v130_v9 = vld [vmem:[#allocation5 + $0x190] sm:$0xff]  ;;  %v131_v10 = vld [vmem:[#allocation5 + $0x198] sm:$0xff] }
  0x18   :  { %240 = vmatpush.msra.mxu1 %v141_v8  ;;  %v132_v11 = vld [vmem:[#allocation5 + $0x1a0] sm:$0xff]  ;;  %v137_v12 = vld [vmem:[#allocation5 + $0x1c8] sm:$0xff]  ;;  %v126_v13 = vld [vmem:[#allocation5 + $0x170] sm:$0xff]  ;;  %221 = vmatpush.msra.mxu0 %v136_v7 }
  0x19   :  { %262 = vmatpush.msra.mxu2 %v134_v4  ;;  %282 = vmatpush.msra.mxu3 %v135_v5  ;;  %v127_v14 = vld [vmem:[#allocation5 + $0x178] sm:$0xff]  ;;  %v133_v15 = vld [vmem:[#allocation5 + $0x1a8] sm:$0xff]  ;;  %v128_v16 = vld [vmem:[#allocation5 + $0x180] sm:$0xff] }
  0x1a   :  { %241 = vmatpush.msra.mxu1 %v137_v12  ;;  %v129_v17 = vld [vmem:[#allocation5 + $0x188] sm:$0xff]  ;;  %v122_v18 = vld [vmem:[#allocation5 + $0x150] sm:$0xff]  ;;  %222 = vmatpush.msra.mxu0 %v132_v11  ;;  %v123_v19 = vld [vmem:[#allocation5 + $0x158] sm:$0xff] }
  0x1b   :  { %263 = vmatpush.msra.mxu2 %v130_v9  ;;  %283 = vmatpush.msra.mxu3 %v131_v10  ;;  %v124_v20 = vld [vmem:[#allocation5 + $0x160] sm:$0xff]  ;;  %v125_v21 = vld [vmem:[#allocation5 + $0x168] sm:$0xff]  ;;  %v118_v22 = vld [vmem:[#allocation5 + $0x130] sm:$0xff] }
  0x1c   :  { %242 = vmatpush.msra.mxu1 %v133_v15  ;;  %223 = vmatpush.msra.mxu0 %v128_v16  ;;  %v119_v23 = vld [vmem:[#allocation5 + $0x138] sm:$0xff]  ;;  %v120_v24 = vld [vmem:[#allocation5 + $0x140] sm:$0xff]  ;;  %v121_v25 = vld [vmem:[#allocation5 + $0x148] sm:$0xff] }
  0x1d   :  { %264 = vmatpush.msra.mxu2 %v126_v13  ;;  %284 = vmatpush.msra.mxu3 %v127_v14  ;;  %v114_v26 = vld [vmem:[#allocation5 + $0x110] sm:$0xff]  ;;  %v115_v27 = vld [vmem:[#allocation5 + $0x118] sm:$0xff]  ;;  %v116_v28 = vld [vmem:[#allocation5 + $0x120] sm:$0xff] }
  0x1e   :  { %243 = vmatpush.msra.mxu1 %v129_v17  ;;  %224 = vmatpush.msra.mxu0 %v124_v20  ;;  %v117_v29 = vld [vmem:[#allocation5 + $0x128] sm:$0xff]  ;;  %v110_v30 = vld [vmem:[#allocation5 + $0xf0] sm:$0xff]  ;;  %v111_v31 = vld [vmem:[#allocation5 + $0xf8] sm:$0xff] }
  0x1f   :  { %265 = vmatpush.msra.mxu2 %v122_v18  ;;  %285 = vmatpush.msra.mxu3 %v123_v19  ;;  %v112_v32 = vld [vmem:[#allocation5 + $0x100] sm:$0xff]  ;;  %v113_v33 = vld [vmem:[#allocation5 + $0x108] sm:$0xff]  ;;  %v106_v34 = vld [vmem:[#allocation5 + $0xd0] sm:$0xff] }
  0x20   :  { %244 = vmatpush.msra.mxu1 %v125_v21  ;;  %225 = vmatpush.msra.mxu0 %v120_v24  ;;  %v107_v35 = vld [vmem:[#allocation5 + $0xd8] sm:$0xff]  ;;  %v108_v36 = vld [vmem:[#allocation5 + $0xe0] sm:$0xff]  ;;  %v109_v37 = vld [vmem:[#allocation5 + $0xe8] sm:$0xff] }
  0x21   :  { %266 = vmatpush.msra.mxu2 %v118_v22  ;;  %286 = vmatpush.msra.mxu3 %v119_v23  ;;  %v102_v38 = vld [vmem:[#allocation5 + $0xb0] sm:$0xff]  ;;  %v103_v39 = vld [vmem:[#allocation5 + $0xb8] sm:$0xff]  ;;  %v104_v40 = vld [vmem:[#allocation5 + $0xc0] sm:$0xff] }
  0x22   :  { %245 = vmatpush.msra.mxu1 %v121_v25  ;;  %226 = vmatpush.msra.mxu0 %v116_v28  ;;  %v105_v41 = vld [vmem:[#allocation5 + $0xc8] sm:$0xff]  ;;  %v98_v42 = vld [vmem:[#allocation5 + $0x90] sm:$0xff]  ;;  %v99_v43 = vld [vmem:[#allocation5 + $0x98] sm:$0xff] }
  0x23   :  { %267 = vmatpush.msra.mxu2 %v114_v26  ;;  %287 = vmatpush.msra.mxu3 %v115_v27  ;;  %v100_v44 = vld [vmem:[#allocation5 + $0xa0] sm:$0xff]  ;;  %v101_v45 = vld [vmem:[#allocation5 + $0xa8] sm:$0xff]  ;;  %v94_v46 = vld [vmem:[#allocation5 + $0x70] sm:$0xff] }
  0x24   :  { %246 = vmatpush.msra.mxu1 %v117_v29  ;;  %227 = vmatpush.msra.mxu0 %v112_v32  ;;  %v95_v47 = vld [vmem:[#allocation5 + $0x78] sm:$0xff]  ;;  %v96_v48 = vld [vmem:[#allocation5 + $0x80] sm:$0xff]  ;;  %v97_v49 = vld [vmem:[#allocation5 + $0x88] sm:$0xff] }
  0x25   :  { %268 = vmatpush.msra.mxu2 %v110_v30  ;;  %288 = vmatpush.msra.mxu3 %v111_v31  ;;  %v90_v50 = vld [vmem:[#allocation5 + $0x50] sm:$0xff]  ;;  %v91_v51 = vld [vmem:[#allocation5 + $0x58] sm:$0xff]  ;;  %v92_v52 = vld [vmem:[#allocation5 + $0x60] sm:$0xff] }
  0x26   :  { %247 = vmatpush.msra.mxu1 %v113_v33  ;;  %228 = vmatpush.msra.mxu0 %v108_v36  ;;  %v93_v53 = vld [vmem:[#allocation5 + $0x68] sm:$0xff]  ;;  %v86_v54 = vld [vmem:[#allocation5 + $0x30] sm:$0xff]  ;;  %v87_v55 = vld [vmem:[#allocation5 + $0x38] sm:$0xff] }
  0x27   :  { %269 = vmatpush.msra.mxu2 %v106_v34  ;;  %289 = vmatpush.msra.mxu3 %v107_v35  ;;  %v88_v56 = vld [vmem:[#allocation5 + $0x40] sm:$0xff]  ;;  %v89_v57 = vld [vmem:[#allocation5 + $0x48] sm:$0xff]  ;;  %v82_v58 = vld [vmem:[#allocation5 + $0x10] sm:$0xff] }
  0x28   :  { %248 = vmatpush.msra.mxu1 %v109_v37  ;;  %229 = vmatpush.msra.mxu0 %v104_v40  ;;  %v83_v59 = vld [vmem:[#allocation5 + $0x18] sm:$0xff]  ;;  %v84_v61 = vld [vmem:[#allocation5 + $0x20] sm:$0xff]  ;;  %v85_v62 = vld [vmem:[#allocation5 + $0x28] sm:$0xff] }
  0x29   :  { %270 = vmatpush.msra.mxu2 %v102_v38  ;;  %290 = vmatpush.msra.mxu3 %v103_v39  ;;  %v210_v60 = vld [vmem:[#allocation2] sm:$0xf]  ;;  %v80_v1 = vld [vmem:[#allocation5] sm:$0xff]  ;;  %v81_v2 = vld [vmem:[#allocation5 + $0x8] sm:$0xff] }
  0x2a   :  { %249 = vmatpush.msra.mxu1 %v105_v41  ;;  %230 = vmatpush.msra.mxu0 %v100_v44  ;;  %v191_v63 = vld [vmem:[#allocation8 + $0x178] sm:$0xff]  ;;  %v190_v4 = vld [vmem:[#allocation8 + $0x170] sm:$0xff]  ;;  %v189_v8 = vld [vmem:[#allocation8 + $0x168] sm:$0xff] }
  0x2b   :  { %271 = vmatpush.msra.mxu2 %v98_v42  ;;  %291 = vmatpush.msra.mxu3 %v99_v43  ;;  %v207_v0 = vld [vmem:[#allocation8 + $0x1f8] sm:$0xff]  ;;  %v206_v6 = vld [vmem:[#allocation8 + $0x1f0] sm:$0xff]  ;;  %v205_v10 = vld [vmem:[#allocation8 + $0x1e8] sm:$0xff] }
  0x2c   :  { %250 = vmatpush.msra.mxu1 %v101_v45  ;;  %231 = vmatpush.msra.mxu0 %v96_v48  ;;  %v159_v3 = vld [vmem:[#allocation8 + $0x78] sm:$0xff]  ;;  %v158_v7 = vld [vmem:[#allocation8 + $0x70] sm:$0xff]  ;;  %v157_v11 = vld [vmem:[#allocation8 + $0x68] sm:$0xff] }
  0x2d   :  { %272 = vmatpush.msra.mxu2 %v94_v46  ;;  %292 = vmatpush.msra.mxu3 %v95_v47  ;;  %v175_v5 = vld [vmem:[#allocation8 + $0xf8] sm:$0xff]  ;;  %v174_v9 = vld [vmem:[#allocation8 + $0xf0] sm:$0xff]  ;;  %v188_v12 = vld [vmem:[#allocation8 + $0x160] sm:$0xff] }
  0x2e   :  { %251 = vmatpush.msra.mxu1 %v97_v49  ;;  %232 = vmatpush.msra.mxu0 %v92_v52  ;;  %v173_v13 = vld [vmem:[#allocation8 + $0xe8] sm:$0xff]  ;;  %v204_v14 = vld [vmem:[#allocation8 + $0x1e0] sm:$0xff]  ;;  %v187_v16 = vld [vmem:[#allocation8 + $0x158] sm:$0xff] }
  0x2f   :  { %273 = vmatpush.msra.mxu2 %v90_v50  ;;  %293 = vmatpush.msra.mxu3 %v91_v51  ;;  %v156_v15 = vld [vmem:[#allocation8 + $0x60] sm:$0xff]  ;;  %v203_v18 = vld [vmem:[#allocation8 + $0x1d8] sm:$0xff]  ;;  %v186_v20 = vld [vmem:[#allocation8 + $0x150] sm:$0xff] }
  0x30   :  { %252 = vmatpush.msra.mxu1 %v93_v53  ;;  %233 = vmatpush.msra.mxu0 %v88_v56  ;;  %v172_v17 = vld [vmem:[#allocation8 + $0xe0] sm:$0xff]  ;;  %v155_v19 = vld [vmem:[#allocation8 + $0x58] sm:$0xff]  ;;  %v202_v22 = vld [vmem:[#allocation8 + $0x1d0] sm:$0xff] }
  0x31   :  { %274 = vmatpush.msra.mxu2 %v86_v54  ;;  %294 = vmatpush.msra.mxu3 %v87_v55  ;;  %v171_v21 = vld [vmem:[#allocation8 + $0xd8] sm:$0xff]  ;;  %v154_v23 = vld [vmem:[#allocation8 + $0x50] sm:$0xff]  ;;  %v185_v24 = vld [vmem:[#allocation8 + $0x148] sm:$0xff] }
  0x32   :  { %253 = vmatpush.msra.mxu1 %v89_v57  ;;  %234 = vmatpush.msra.mxu0 %v84_v61  ;;  %v170_v25 = vld [vmem:[#allocation8 + $0xd0] sm:$0xff]  ;;  %v201_v26 = vld [vmem:[#allocation8 + $0x1c8] sm:$0xff]  ;;  %v184_v28 = vld [vmem:[#allocation8 + $0x140] sm:$0xff] }
  0x33   :  { %275 = vmatpush.msra.mxu2 %v82_v58  ;;  %295 = vmatpush.msra.mxu3 %v83_v59  ;;  %v153_v27 = vld [vmem:[#allocation8 + $0x48] sm:$0xff]  ;;  %v200_v30 = vld [vmem:[#allocation8 + $0x1c0] sm:$0xff]  ;;  %v183_v32 = vld [vmem:[#allocation8 + $0x138] sm:$0xff] }
  0x34   :  { %276 = vmatmul.f32.vlgmr.msra.gmra.mxu2 %v210_v60  ;;  %296 = vmatmul.f32.vlgmr.msra.gmra.mxu3 %v210_v60  ;;  %v169_v29 = vld [vmem:[#allocation8 + $0xc8] sm:$0xff]  ;;  %v152_v31 = vld [vmem:[#allocation8 + $0x40] sm:$0xff]  ;;  %v199_v34 = vld [vmem:[#allocation8 + $0x1b8] sm:$0xff] }
  0x35   :  { %254 = vmatpush.msra.mxu1 %v85_v62  ;;  %347 = vmatpush.msrb.mxu2 %v191_v63  ;;  %v168_v33 = vld [vmem:[#allocation8 + $0xc0] sm:$0xff]  ;;  %v151_v35 = vld [vmem:[#allocation8 + $0x38] sm:$0xff]  ;;  %v182_v36 = vld [vmem:[#allocation8 + $0x130] sm:$0xff] }
  0x36   :  { %367 = vmatpush.msrb.mxu3 %v207_v0  ;;  %235 = vmatpush.msra.mxu0 %v80_v1  ;;  %v167_v37 = vld [vmem:[#allocation8 + $0xb8] sm:$0xff]  ;;  %v198_v38 = vld [vmem:[#allocation8 + $0x1b0] sm:$0xff]  ;;  %v181_v40 = vld [vmem:[#allocation8 + $0x128] sm:$0xff] }
  0x37   :  { %255 = vmatpush.msra.mxu1 %v81_v2  ;;  %236 = vmatmul.f32.vlgmr.msra.gmra.mxu0 %v210_v60  ;;  %v150_v39 = vld [vmem:[#allocation8 + $0x30] sm:$0xff]  ;;  %v197_v42 = vld [vmem:[#allocation8 + $0x1a8] sm:$0xff]  ;;  %v180_v44 = vld [vmem:[#allocation8 + $0x120] sm:$0xff] }
  0x38   :  { %256 = vmatmul.f32.vlgmr.msra.gmra.mxu1 %v210_v60  ;;  %307 = vmatpush.msrb.mxu0 %v159_v3  ;;  %v166_v41 = vld [vmem:[#allocation8 + $0xb0] sm:$0xff]  ;;  %v149_v43 = vld [vmem:[#allocation8 + $0x28] sm:$0xff]  ;;  %v196_v46 = vld [vmem:[#allocation8 + $0x1a0] sm:$0xff] }
  0x39   :  { %348 = vmatpush.msrb.mxu2 %v190_v4  ;;  %327 = vmatpush.msrb.mxu1 %v175_v5  ;;  %v165_v45 = vld [vmem:[#allocation8 + $0xa8] sm:$0xff]  ;;  %v148_v47 = vld [vmem:[#allocation8 + $0x20] sm:$0xff]  ;;  %v179_v48 = vld [vmem:[#allocation8 + $0x118] sm:$0xff] }
  0x3a   :  { %368 = vmatpush.msrb.mxu3 %v206_v6  ;;  %308 = vmatpush.msrb.mxu0 %v158_v7  ;;  %v147_v49 = vld [vmem:[#allocation8 + $0x18] sm:$0xff]  ;;  %v164_v50 = vld [vmem:[#allocation8 + $0xa0] sm:$0xff]  ;;  %v178_v51 = vld [vmem:[#allocation8 + $0x110] sm:$0xff] }
  0x3b   :  { %349 = vmatpush.msrb.mxu2 %v189_v8  ;;  %328 = vmatpush.msrb.mxu1 %v174_v9  ;;  %v195_v52 = vld [vmem:[#allocation8 + $0x198] sm:$0xff]  ;;  %v146_v53 = vld [vmem:[#allocation8 + $0x10] sm:$0xff]  ;;  %v177_v55 = vld [vmem:[#allocation8 + $0x108] sm:$0xff] }
  0x3c   :  { %369 = vmatpush.msrb.mxu3 %v205_v10  ;;  %309 = vmatpush.msrb.mxu0 %v157_v11  ;;  %v163_v54 = vld [vmem:[#allocation8 + $0x98] sm:$0xff]  ;;  %v194_v56 = vld [vmem:[#allocation8 + $0x190] sm:$0xff]  ;;  %v145_v57 = vld [vmem:[#allocation8 + $0x8] sm:$0xff] }
  0x3d   :  { %350 = vmatpush.msrb.mxu2 %v188_v12  ;;  %329 = vmatpush.msrb.mxu1 %v173_v13  ;;  %v162_v58 = vld [vmem:[#allocation8 + $0x90] sm:$0xff]  ;;  %v176_v59 = vld [vmem:[#allocation8 + $0x100] sm:$0xff]  ;;  %v193_v60 = vld [vmem:[#allocation8 + $0x188] sm:$0xff] }
  0x3e   :  { %370 = vmatpush.msrb.mxu3 %v204_v14  ;;  %310 = vmatpush.msrb.mxu0 %v156_v15  ;;  %v144_v61 = vld [vmem:[#allocation8] sm:$0xff]  ;;  %v161_v62 = vld [vmem:[#allocation8 + $0x88] sm:$0xff]  ;;  %v208_v1 = vld [vmem:[#allocation7] sm:$0xf] }
  0x3f   :  { %351 = vmatpush.msrb.mxu2 %v187_v16  ;;  %330 = vmatpush.msrb.mxu1 %v172_v17  ;;  %v192_v63 = vld [vmem:[#allocation8 + $0x180] sm:$0xff]  ;;  %v212_v2 = vperm.slane %v208_v1, 0  ;;  %v213_v3 = vperm.slane %v208_v1, 1  ;;  %v214_v4 = vperm.slane %v208_v1, 2  ;;  %v215_v5 = vperm.slane %v208_v1, 3 }
  0x40   :  { %371 = vmatpush.msrb.mxu3 %v203_v18  ;;  %311 = vmatpush.msrb.mxu0 %v155_v19  ;;  %v160_v0 = vld [vmem:[#allocation8 + $0x80] sm:$0xff]  ;;  %v416_v18 = vld [vmem:[%s606_s4] ss:$0 sm:$0xff] }
  0x41   :  { %352 = vmatpush.msrb.mxu2 %v186_v20  ;;  %331 = vmatpush.msrb.mxu1 %v171_v21 }
  0x42   :  { %372 = vmatpush.msrb.mxu3 %v202_v22  ;;  %312 = vmatpush.msrb.mxu0 %v154_v23 }
  0x43   :  { %353 = vmatpush.msrb.mxu2 %v185_v24  ;;  %332 = vmatpush.msrb.mxu1 %v170_v25 }
  0x44   :  { %373 = vmatpush.msrb.mxu3 %v201_v26  ;;  %313 = vmatpush.msrb.mxu0 %v153_v27 }
  0x45   :  { %354 = vmatpush.msrb.mxu2 %v184_v28  ;;  %333 = vmatpush.msrb.mxu1 %v169_v29 }
  0x46   :  { %374 = vmatpush.msrb.mxu3 %v200_v30  ;;  %314 = vmatpush.msrb.mxu0 %v152_v31 }
  0x47   :  { %355 = vmatpush.msrb.mxu2 %v183_v32  ;;  %334 = vmatpush.msrb.mxu1 %v168_v33 }
  0x48   :  { %375 = vmatpush.msrb.mxu3 %v199_v34  ;;  %315 = vmatpush.msrb.mxu0 %v151_v35 }
  0x49   :  { %356 = vmatpush.msrb.mxu2 %v182_v36  ;;  %335 = vmatpush.msrb.mxu1 %v167_v37 }
  0x4a   :  { %376 = vmatpush.msrb.mxu3 %v198_v38  ;;  %316 = vmatpush.msrb.mxu0 %v150_v39 }
  0x4b   :  { %357 = vmatpush.msrb.mxu2 %v181_v40  ;;  %336 = vmatpush.msrb.mxu1 %v166_v41 }
  0x4c   :  { %377 = vmatpush.msrb.mxu3 %v197_v42  ;;  %317 = vmatpush.msrb.mxu0 %v149_v43 }
  0x4d   :  { %358 = vmatpush.msrb.mxu2 %v180_v44  ;;  %337 = vmatpush.msrb.mxu1 %v165_v45 }
  0x4e   :  { %378 = vmatpush.msrb.mxu3 %v196_v46  ;;  %318 = vmatpush.msrb.mxu0 %v148_v47 }
  0x4f   :  { %359 = vmatpush.msrb.mxu2 %v179_v48  ;;  %338 = vmatpush.msrb.mxu1 %v164_v50 }
  0x50   :  { %319 = vmatpush.msrb.mxu0 %v147_v49  ;;  %379 = vmatpush.msrb.mxu3 %v195_v52 }
  0x51   :  { %360 = vmatpush.msrb.mxu2 %v178_v51  ;;  %339 = vmatpush.msrb.mxu1 %v163_v54 }
  0x52   :  { %320 = vmatpush.msrb.mxu0 %v146_v53  ;;  %380 = vmatpush.msrb.mxu3 %v194_v56 }
  0x53   :  { %361 = vmatpush.msrb.mxu2 %v177_v55  ;;  %340 = vmatpush.msrb.mxu1 %v162_v58 }
  0x54   :  { %321 = vmatpush.msrb.mxu0 %v145_v57  ;;  %381 = vmatpush.msrb.mxu3 %v193_v60 }
  0x55   :  { %362 = vmatpush.msrb.mxu2 %v176_v59  ;;  %341 = vmatpush.msrb.mxu1 %v161_v62 }
  0x56   :  { %322 = vmatpush.msrb.mxu0 %v144_v61  ;;  %382 = vmatpush.msrb.mxu3 %v192_v63 }
  0x57   :  { %342 = vmatpush.msrb.mxu1 %v160_v0 }
  0xb4   :  { %v237_v6 = vpop.f32.mrf.mxu0 }
  0xb5   :  { %v257_v7 = vpop.f32.mrf.mxu1  ;;  %v238_v8 = vadd.f32 %v237_v6, %v212_v2 }
  0xb6   :  { %v258_v9 = vadd.f32 %v257_v7, %v213_v3 }
  0xb7   :  { %v277_v10 = vpop.f32.mrf.mxu2  ;;  %v297_v11 = vpop.f32.mrf.mxu3  ;;  %v300_v13 = vmax.f32 %v238_v8, 0.0 }
  0xb8   :  { %v278_v12 = vadd.f32 %v277_v10, %v214_v4  ;;  %v298_v14 = vadd.f32 %v297_v11, %v215_v5  ;;  %v301_v15 = vmax.f32 %v258_v9, 0.0 }
  0xb9   :  { %323 = vmatmul.f32.vlgmr.msrb.gmra.mxu0 %v300_v13 }
  0xba   :  { %v302_v16 = vmax.f32 %v278_v12, 0.0  ;;  %v303_v17 = vmax.f32 %v298_v14, 0.0  ;;  %343 = vmatmul.f32.vlgmr.msrb.gmra.mxu1 %v301_v15 }
  0xbc   :  { %363 = vmatmul.f32.vlgmr.msrb.gmra.mxu2 %v302_v16  ;;  %383 = vmatmul.f32.vlgmr.msrb.gmra.mxu3 %v303_v17 }
 0x136   :  { %v324_v19 = vpop.f32.mrf.mxu0 }
 0x137   :  { %v325_v20 = vadd.f32 %v416_v18, %v324_v19  ;;  %v344_v21 = vpop.f32.mrf.mxu1 }
 0x139   :  { %v345_v22 = vadd.f32 %v344_v21, %v325_v20 }
 0x13f   :  { %v364_v23 = vpop.f32.mrf.mxu2  ;;  %v384_v24 = vpop.f32.mrf.mxu3 }
 0x140   :  { %v365_v25 = vadd.f32 %v364_v23, %v345_v22 }
 0x142   :  { %v385_v26 = vadd.f32 %v384_v24, %v365_v25 }
 0x144   :  { %387 = vst [vmem:[#allocation10] sm:$0xf] %v385_v26 }
 0x145   :  { %398 = dma.vmem_to_hbm [thread:$0]  %s394_s16, 64, %s396_s19, [#allocation4]  }
 0x146   :  { %543 = dma.done.wait [#allocation4], 64  }
 0x147   :  { %544 = vsyncadd [#allocation4], 4294967232 }
 0x148   :  { %403 = vsyncpa [#allocation3], 1 }
 0x149   :  { %404 = vsyncpa [#allocation6], 1 }
 0x14a   :  { %405 = vsyncpa [#allocation9], 1 }
 0x14b   :  { %406 = vsyncpa [#allocation4], 1 }

</bundles_post_ra>
